<compile_context>
chip_gen: v5e
topology: v5e:2x2
jax: 0.10.0
libtpu: 0.0.40
codegen_flags: <defaults>
</compile_context>

<pallas_src>
import jax
import jax.numpy as jnp
from jax import lax
from jax.experimental import pallas as pl
from jax.experimental.pallas import tpu as pltpu


def _round_up(x, m):
    return ((x + m - 1) // m) * m


def transh_score_kernel(rel_ref, h_ref, t_ref, rtab_ref, ntab_ref, out_ref):
    """One batch tile of TransH scores.

    rel_ref : (tb, 1)   int32      relation ids for this tile
    h_ref   : (tb, D)   bf16/f32   gathered head embeddings
    t_ref   : (tb, D)   bf16/f32   gathered tail embeddings
    rtab_ref: (Rpad, D) f32        full relation-embedding table (VMEM)
    ntab_ref: (Rpad, D) f32        full hyperplane-normal table (VMEM)
    out_ref : (1, tb)   f32        lane-dense scores
    """
    f32 = jnp.float32
    tb = h_ref.shape[0]
    num_rel_pad = rtab_ref.shape[0]

    # In-kernel relation gather: exact 0/1 one-hot times the VMEM-resident
    # table on the (idle) MXU.  Padded table rows are never selected.
    idx = rel_ref[...]                                             # (tb, 1)
    iota = lax.broadcasted_iota(jnp.int32, (tb, num_rel_pad), 1)   # (tb, Rpad)
    one_hot = (iota == idx).astype(f32)                            # (tb, Rpad)
    r = jnp.dot(one_hot, rtab_ref[...], preferred_element_type=f32)  # (tb, D)
    n = jnp.dot(one_hot, ntab_ref[...], preferred_element_type=f32)  # (tb, D)

    h = h_ref[...].astype(f32)
    t = t_ref[...].astype(f32)

    # Fused TransH hyperplane-projection difference.
    d = h - t
    ddot = jnp.sum(d * n, axis=1, keepdims=True)                   # (tb, 1)
    diff = d + r - ddot * n                                        # (tb, D)

    scores = jnp.sum(jnp.abs(diff), axis=1)                        # (tb,)  L1
    out_ref[...] = scores[None, :]                                 # lane-dense


def _vmem_capacity_bytes():
    # Chip-aware VMEM capacity (v5e/v6e: 128 MiB, v7x: 64 MiB per TC).
    try:
        cap = getattr(pltpu.get_tpu_info(), "vmem_capacity_bytes", None)
        if cap:
            return int(cap)
    except Exception:
        pass
    return 64 * 1024 * 1024  # conservative (v7x-sized) fallback


def _vmem_need_bytes(tb, emb_dim, num_rel_pad, stream_itemsize):
    """Rough VMEM requirement, accounting for lane padding when D < 128."""
    d_lanes = _round_up(emb_dim, 128)
    nr_lanes = _round_up(num_rel_pad, 128)
    stream_tiles = 2 * 2 * tb * d_lanes * stream_itemsize      # h + t, x2 buffers
    idx_tiles = 2 * tb * 128 * 4                               # (tb, 1) int32
    out_tiles = 2 * 8 * tb * 4                                 # (1, tb) f32
    tables = 2 * 2 * _round_up(num_rel_pad, 8) * d_lanes * 4   # r + n tables
    # f32 in-kernel intermediates (one-hot, r, n, d, diff, ...).
    scratch = tb * (nr_lanes + 6 * d_lanes) * 4
    return stream_tiles + idx_tiles + out_tiles + tables + scratch


def _pick_batch_tile(batch, emb_dim, num_rel_pad, stream_itemsize, vmem_cap):
    budget = int(vmem_cap * 0.55)  # headroom for Mosaic internal scratch
    # Prefer >= 2 grid steps once batch exceeds one tile so the "parallel"
    # batch axis can span both TensorCores on v7x (no effect on v5e/v6e).
    if batch > 128:
        want = _round_up(-(-batch // 2), 128)
    else:
        want = 128
    tb = min(want, 2048)
    while tb > 128 and _vmem_need_bytes(tb, emb_dim, num_rel_pad, stream_itemsize) > budget:
        tb -= 128
    return max(tb, 128)


def transh_forward(ent_embs, rel_embs, norm_vector, heads, rels, tails, *,
                   tb=None, entity_stream_dtype=jnp.bfloat16):
    """TransH scores for (heads, rels, tails) triples. Returns (B,) float32."""
    B = heads.shape[0]
    num_rel, D = rel_embs.shape
    stream_dtype = jnp.dtype(entity_stream_dtype)
    vmem_cap = _vmem_capacity_bytes()

    # Pad the (tiny, VMEM-resident) relation tables so the one-hot contraction
    # dim is lane-aligned.  Padded rows are never selected (ids < num_rel).
    # Note: assumes num_rel is small (standard for KG models); large tables
    # shrink the batch tile via the VMEM budget below.
    num_rel_pad = _round_up(num_rel, 128)
    rel_tab = jnp.pad(rel_embs.astype(jnp.float32),
                      ((0, num_rel_pad - num_rel), (0, 0)))
    norm_tab = jnp.pad(norm_vector.astype(jnp.float32),
                       ((0, num_rel_pad - num_rel), (0, 0)))

    if tb is None:
        tb = _pick_batch_tile(B, D, num_rel_pad, stream_dtype.itemsize, vmem_cap)
    assert tb % 128 == 0, "batch tile must be a multiple of 128 (lane-dense out)"

    B_pad = _round_up(B, tb)
    if B_pad != B:
        pad = (0, B_pad - B)
        heads = jnp.pad(heads, pad)   # index 0: valid row, sliced off below
        rels = jnp.pad(rels, pad)
        tails = jnp.pad(tails, pad)

    # Entity gathers stay in XLA (glue); stream them to the kernel in bf16 to
    # halve the bytes of the two large HBM streams.  Compute stays f32.
    h_embs = jnp.take(ent_embs, heads, axis=0).astype(stream_dtype)   # (B_pad, D)
    t_embs = jnp.take(ent_embs, tails, axis=0).astype(stream_dtype)   # (B_pad, D)
    rel_ids = rels.astype(jnp.int32).reshape(B_pad, 1)

    row_spec = pl.BlockSpec((tb, D), lambda i: (i, 0))
    idx_spec = pl.BlockSpec((tb, 1), lambda i: (i, 0))
    tab_spec = pl.BlockSpec((num_rel_pad, D), lambda i: (0, 0))  # fetched once
    out_spec = pl.BlockSpec((1, tb), lambda i: (0, i))

    vmem_need = _vmem_need_bytes(tb, D, num_rel_pad, stream_dtype.itemsize)
    vmem_limit = int(min(vmem_cap, max(vmem_need + (16 << 20), 32 << 20)))

    scores = pl.pallas_call(
        transh_score_kernel,
        out_shape=jax.ShapeDtypeStruct((1, B_pad), jnp.float32),
        grid_spec=pltpu.PrefetchScalarGridSpec(
            num_scalar_prefetch=0,
            grid=(B_pad // tb,),
            in_specs=[idx_spec, row_spec, row_spec, tab_spec, tab_spec],
            out_specs=out_spec,
        ),
        compiler_params=pltpu.CompilerParams(
            dimension_semantics=("parallel",),
            vmem_limit_bytes=vmem_limit,
        ),
    )(rel_ids, h_embs, t_embs, rel_tab, norm_tab)

    return scores[0, :B]                                           # (B,)


def xavier_uniform(key, shape, dtype=jnp.float32):
    fan_in, fan_out = shape[0], shape[1]
    bound = (6.0 / (fan_in + fan_out)) ** 0.5
    return jax.random.uniform(key, shape, dtype=dtype, minval=-bound, maxval=bound)


def reference_forward(ent_embs, rel_embs, norm_vector, heads, rels, tails):
    h = jnp.take(ent_embs, heads, axis=0)
    r = jnp.take(rel_embs, rels, axis=0)
    t = jnp.take(ent_embs, tails, axis=0)
    n = jnp.take(norm_vector, rels, axis=0)

    def project(e, w):
        return e - jnp.sum(e * w, axis=1, keepdims=True) * w

    return jnp.sum(jnp.abs(project(h, n) + r - project(t, n)), axis=1)


if __name__ == "__main__":
    num_ent, num_rel, emb_dim = 64, 16, 32
    batch = 16

    key = jax.random.PRNGKey(0)
    k_ent, k_rel, k_norm, k_h, k_r, k_t = jax.random.split(key, 6)

    # Deterministic parameter init (xavier_uniform, matching the module shapes).
    ent_embs = xavier_uniform(k_ent, (num_ent, emb_dim))
    rel_embs = xavier_uniform(k_rel, (num_rel, emb_dim))
    norm_vector = xavier_uniform(k_norm, (num_rel, emb_dim))

    heads = jax.random.randint(k_h, (batch,), 0, num_ent, dtype=jnp.int32)
    rels = jax.random.randint(k_r, (batch,), 0, num_rel, dtype=jnp.int32)
    tails = jax.random.randint(k_t, (batch,), 0, num_ent, dtype=jnp.int32)

    fwd = jax.jit(transh_forward)
    scores = jax.block_until_ready(
        fwd(ent_embs, rel_embs, norm_vector, heads, rels, tails))

    ref = reference_forward(ent_embs, rel_embs, norm_vector, heads, rels, tails)
    assert scores.shape == (batch,)
    # bf16 entity streams + MXU relation gather => bf16-level tolerance vs f32 ref.
    assert jnp.allclose(scores, ref, atol=2e-2, rtol=2e-2), (
        float(jnp.max(jnp.abs(scores - ref))))

    print("KERNEL_OK")
</pallas_src>

<mosaic_0001>
module attributes {stable_mosaic.version = 11 : i64} {
  func.func @transh_score_kernel(%arg0: i32, %arg1: memref<128x1xi32, #tpu.memory_space<vmem>>, %arg2: memref<128x32xbf16, #tpu.memory_space<vmem>>, %arg3: memref<128x32xbf16, #tpu.memory_space<vmem>>, %arg4: memref<128x32xf32, #tpu.memory_space<vmem>>, %arg5: memref<128x32xf32, #tpu.memory_space<vmem>>, %arg6: memref<1x128xf32, #tpu.memory_space<vmem>>) attributes {dimension_semantics = [#tpu.dimension_semantics<parallel>], iteration_bounds = array<i64: 1>, scalar_prefetch = 0 : i64, scratch_operands = 0 : i64, tpu.core_type = #tpu.core_type<tc>, window_params = [{transform_indices = @transform_0, window_bounds = array<i64: 128, 1>}, {transform_indices = @transform_1, window_bounds = array<i64: 128, 32>}, {transform_indices = @transform_2, window_bounds = array<i64: 128, 32>}, {pipeline_mode = #tpu.pipeline_mode<synchronous>, transform_indices = @transform_3, window_bounds = array<i64: 128, 32>}, {pipeline_mode = #tpu.pipeline_mode<synchronous>, transform_indices = @transform_4, window_bounds = array<i64: 128, 32>}, {transform_indices = @transform_5, window_bounds = array<i64: 1, 128>}]} {
    %c0 = arith.constant 0 : index
    %c0_0 = arith.constant 0 : index
    %0 = vector.load %arg1[%c0, %c0_0] : memref<128x1xi32, #tpu.memory_space<vmem>>, vector<128x1xi32>
    %1 = tpu.iota {dimensions = array<i32: 1>} : vector<128x128xi32>
    %2 = vector.broadcast %0 : vector<128x1xi32> to vector<128x128xi32>
    %3 = arith.cmpi eq, %1, %2 : vector<128x128xi32>
    %4 = arith.extui %3 : vector<128x128xi1> to vector<128x128xi32>
    %5 = arith.sitofp %4 : vector<128x128xi32> to vector<128x128xf32>
    %c0_1 = arith.constant 0 : index
    %c0_2 = arith.constant 0 : index
    %6 = vector.load %arg4[%c0_1, %c0_2] : memref<128x32xf32, #tpu.memory_space<vmem>>, vector<128x32xf32>
    %cst = arith.constant dense<0.000000e+00> : vector<128x32xf32>
    %7 = tpu.matmul %5, %6, %cst {dimension_numbers = #tpu.dot_dimension_numbers<[1], [0], [0], [1], [0, 0, 1, 1], [], []>} : vector<128x128xf32>, vector<128x32xf32>, vector<128x32xf32> -> vector<128x32xf32>
    %c0_3 = arith.constant 0 : index
    %c0_4 = arith.constant 0 : index
    %8 = vector.load %arg5[%c0_3, %c0_4] : memref<128x32xf32, #tpu.memory_space<vmem>>, vector<128x32xf32>
    %cst_5 = arith.constant dense<0.000000e+00> : vector<128x32xf32>
    %9 = tpu.matmul %5, %8, %cst_5 {dimension_numbers = #tpu.dot_dimension_numbers<[1], [0], [0], [1], [0, 0, 1, 1], [], []>} : vector<128x128xf32>, vector<128x32xf32>, vector<128x32xf32> -> vector<128x32xf32>
    %c0_6 = arith.constant 0 : index
    %c0_7 = arith.constant 0 : index
    %10 = vector.load %arg2[%c0_6, %c0_7] : memref<128x32xbf16, #tpu.memory_space<vmem>>, vector<128x32xbf16>
    %11 = arith.extf %10 : vector<128x32xbf16> to vector<128x32xf32>
    %c0_8 = arith.constant 0 : index
    %c0_9 = arith.constant 0 : index
    %12 = vector.load %arg3[%c0_8, %c0_9] : memref<128x32xbf16, #tpu.memory_space<vmem>>, vector<128x32xbf16>
    %13 = arith.extf %12 : vector<128x32xbf16> to vector<128x32xf32>
    %14 = arith.subf %11, %13 : vector<128x32xf32>
    %15 = arith.mulf %14, %9 : vector<128x32xf32>
    %cst_10 = arith.constant dense<0.000000e+00> : vector<128xf32>
    %16 = vector.multi_reduction <add>, %15, %cst_10 [1] : vector<128x32xf32> to vector<128xf32>
    %17 = vector.shape_cast %16 : vector<128xf32> to vector<128x1xf32>
    %18 = arith.addf %14, %7 : vector<128x32xf32>
    %19 = vector.broadcast %17 : vector<128x1xf32> to vector<128x32xf32>
    %20 = arith.mulf %19, %9 : vector<128x32xf32>
    %21 = arith.subf %18, %20 : vector<128x32xf32>
    %22 = math.absf %21 : vector<128x32xf32>
    %cst_11 = arith.constant dense<0.000000e+00> : vector<128xf32>
    %23 = vector.multi_reduction <add>, %22, %cst_11 [1] : vector<128x32xf32> to vector<128xf32>
    %24 = vector.shape_cast %23 : vector<128xf32> to vector<1x128xf32>
    %c0_12 = arith.constant 0 : index
    %c0_13 = arith.constant 0 : index
    %25 = vector.load %arg6[%c0_12, %c0_13] : memref<1x128xf32, #tpu.memory_space<vmem>>, vector<1x128xf32>
    tpu.vector_store %arg6[%c0_12, %c0_13], %24 {strides = array<i32>} : memref<1x128xf32, #tpu.memory_space<vmem>>, vector<1x128xf32>,
    return
  }
  func.func @transform_0(%arg0: i32) -> (i32, i32) {
    %c0_i32 = arith.constant 0 : i32
    %c0_i32_0 = arith.constant 0 : i32
    return %arg0, %c0_i32 : i32, i32
  }
  func.func @transform_1(%arg0: i32) -> (i32, i32) {
    %c0_i32 = arith.constant 0 : i32
    %c0_i32_0 = arith.constant 0 : i32
    return %arg0, %c0_i32 : i32, i32
  }
  func.func @transform_2(%arg0: i32) -> (i32, i32) {
    %c0_i32 = arith.constant 0 : i32
    %c0_i32_0 = arith.constant 0 : i32
    return %arg0, %c0_i32 : i32, i32
  }
  func.func @transform_3(%arg0: i32) -> (i32, i32) {
    %c0_i32 = arith.constant 0 : i32
    %c0_i32_0 = arith.constant 0 : i32
    %c0_i32_1 = arith.constant 0 : i32
    return %c0_i32, %c0_i32_0 : i32, i32
  }
  func.func @transform_4(%arg0: i32) -> (i32, i32) {
    %c0_i32 = arith.constant 0 : i32
    %c0_i32_0 = arith.constant 0 : i32
    %c0_i32_1 = arith.constant 0 : i32
    return %c0_i32, %c0_i32_0 : i32, i32
  }
  func.func @transform_5(%arg0: i32) -> (i32, i32) {
    %c0_i32 = arith.constant 0 : i32
    %c0_i32_0 = arith.constant 0 : i32
    return %c0_i32, %arg0 : i32, i32
  }
}

</mosaic_0001>

<bundles_post_ra>
// kernel: transh_forward.1
= control target key start
LH: loop header
LB: loop body
LE: loop exit
PB: predicated region body
PF: predicated region fallthrough
CT: control target
= control target key end

     0   :  { %v799_v0 = vmov 0   ;;  %v36_v49 = vlaneseq  ;;  %v800_v52 = vmov 1.0   ;;  %s1220_s0 = inlined_call_operand.vmem [shape: s32[128,1], index: 0, kind: input, shape index: {}]   ;;  %s1221_s3 = inlined_call_operand.vmem [shape: f32[128,32], index: 3, kind: input, shape index: {}]   ;;  %s1222_s4 = inlined_call_operand.vmem [shape: f32[128,32], index: 4, kind: input, shape index: {}]   ;;  %s1223_s1 = inlined_call_operand.vmem [shape: bf16[128,32], index: 1, kind: input, shape index: {}]   ;;  %s1224_s2 = inlined_call_operand.vmem [shape: bf16[128,32], index: 2, kind: input, shape index: {}]   ;;  %s1225_s5 = inlined_call_operand.vmem [shape: f32[1,128], index: 5, kind: output, shape index: {}]  }
   0x1   :  { %797 = vset.pattern.permute.xlu1 %v799_v0  ;;  %796 = vset.pattern.permute.xlu0 %v799_v0  ;;  %v21_v1 = vld [vmem:[%s1220_s0 + $0x8] sm:$0xff]  ;;  %v20_v2 = vld [vmem:[%s1220_s0] sm:$0xff]  ;;  %v22_v3 = vld [vmem:[%s1220_s0 + $0x10] sm:$0xff] }
   0x2   :  { %42 = vperm.xlu1 %797, %v21_v1   ;;  %39 = vperm.xlu0 %796, %v20_v2   ;;  %v29_v4 = vld [vmem:[%s1220_s0 + $0x48] sm:$0xff]  ;;  %v28_v5 = vld [vmem:[%s1220_s0 + $0x40] sm:$0xff]  ;;  %v30_v6 = vld [vmem:[%s1220_s0 + $0x50] sm:$0xff]  ;;  %v975_v50 = vand.u32 127, %v36_v49 }
   0x3   :  { %798 = vset.pattern.permute.xlu2 %v799_v0  ;;  %v149_v7 = vld [vmem:[%s1221_s3 + $0x78] sm:$0xff]  ;;  %v148_v9 = vld [vmem:[%s1221_s3 + $0x70] sm:$0xff]  ;;  %v147_v11 = vld [vmem:[%s1221_s3 + $0x68] sm:$0xff] }
   0x4   :  { %45 = vperm.xlu2 %798, %v22_v3   ;;  %v230_v8 = vld [vmem:[%s1222_s4 + $0x78] sm:$0xff]  ;;  %150 = vmatpush.msra.mxu0 %v149_v7  ;;  %v229_v10 = vld [vmem:[%s1222_s4 + $0x70] sm:$0xff]  ;;  %v228_v12 = vld [vmem:[%s1222_s4 + $0x68] sm:$0xff] }
   0x5   :  { %231 = vmatpush.msra.mxu1 %v230_v8  ;;  %762 = vmatpush.msra.mxu2 %v149_v7  ;;  %v146_v13 = vld [vmem:[%s1221_s3 + $0x60] sm:$0xff]  ;;  %v31_v15 = vld [vmem:[%s1220_s0 + $0x58] sm:$0xff]  ;;  %v144_v20 = vld [vmem:[%s1221_s3 + $0x50] sm:$0xff] }
   0x6   :  { %151 = vmatpush.msra.mxu0 %v148_v9  ;;  %v227_v14 = vld [vmem:[%s1222_s4 + $0x60] sm:$0xff]  ;;  %778 = vmatpush.msra.mxu3 %v230_v8  ;;  %v23_v16 = vld [vmem:[%s1220_s0 + $0x18] sm:$0xff]  ;;  %v225_v21 = vld [vmem:[%s1222_s4 + $0x50] sm:$0xff] }
   0x7   :  { %232 = vmatpush.msra.mxu1 %v229_v10  ;;  %763 = vmatpush.msra.mxu2 %v148_v9  ;;  %v145_v17 = vld [vmem:[%s1221_s3 + $0x58] sm:$0xff]  ;;  %v24_v19 = vld [vmem:[%s1220_s0 + $0x20] sm:$0xff]  ;;  %v143_v22 = vld [vmem:[%s1221_s3 + $0x48] sm:$0xff] }
   0x8   :  { %152 = vmatpush.msra.mxu0 %v147_v11  ;;  %v226_v18 = vld [vmem:[%s1222_s4 + $0x58] sm:$0xff]  ;;  %779 = vmatpush.msra.mxu3 %v229_v10  ;;  %v224_v23 = vld [vmem:[%s1222_s4 + $0x48] sm:$0xff]  ;;  %v32_v25 = vld [vmem:[%s1220_s0 + $0x60] sm:$0xff] }
   0x9   :  { %233 = vmatpush.msra.mxu1 %v228_v12  ;;  %764 = vmatpush.msra.mxu2 %v147_v11  ;;  %v25_v24 = vld [vmem:[%s1220_s0 + $0x28] sm:$0xff]  ;;  %v34_v27 = vld [vmem:[%s1220_s0 + $0x70] sm:$0xff]  ;;  %v27_v29 = vld [vmem:[%s1220_s0 + $0x38] sm:$0xff] }
   0xa   :  { %66 = vperm.xlu1 %797, %v29_v4   ;;  %63 = vperm.xlu0 %796, %v28_v5   ;;  %v33_v26 = vld [vmem:[%s1220_s0 + $0x68] sm:$0xff]  ;;  %v26_v28 = vld [vmem:[%s1220_s0 + $0x30] sm:$0xff]  ;;  %v35_v30 = vld [vmem:[%s1220_s0 + $0x78] sm:$0xff] }
   0xb   :  { %153 = vmatpush.msra.mxu0 %v146_v13  ;;  %234 = vmatpush.msra.mxu1 %v227_v14  ;;  %v142_v31 = vld [vmem:[%s1221_s3 + $0x40] sm:$0xff]  ;;  %v141_v33 = vld [vmem:[%s1221_s3 + $0x38] sm:$0xff]  ;;  %v140_v35 = vld [vmem:[%s1221_s3 + $0x30] sm:$0xff] }
   0xc   :  { %69 = vperm.xlu2 %798, %v30_v6   ;;  %780 = vmatpush.msra.mxu3 %v228_v12  ;;  %v223_v32 = vld [vmem:[%s1222_s4 + $0x40] sm:$0xff]  ;;  %v222_v34 = vld [vmem:[%s1222_s4 + $0x38] sm:$0xff]  ;;  %v221_v36 = vld [vmem:[%s1222_s4 + $0x30] sm:$0xff] }
   0xd   :  { %154 = vmatpush.msra.mxu0 %v145_v17  ;;  %235 = vmatpush.msra.mxu1 %v226_v18  ;;  %v139_v37 = vld [vmem:[%s1221_s3 + $0x28] sm:$0xff]  ;;  %v138_v39 = vld [vmem:[%s1221_s3 + $0x20] sm:$0xff]  ;;  %v137_v41 = vld [vmem:[%s1221_s3 + $0x18] sm:$0xff] }
   0xe   :  { %765 = vmatpush.msra.mxu2 %v146_v13  ;;  %781 = vmatpush.msra.mxu3 %v227_v14  ;;  %v220_v38 = vld [vmem:[%s1222_s4 + $0x28] sm:$0xff]  ;;  %v219_v40 = vld [vmem:[%s1222_s4 + $0x20] sm:$0xff]  ;;  %v218_v42 = vld [vmem:[%s1222_s4 + $0x18] sm:$0xff] }
   0xf   :  { %155 = vmatpush.msra.mxu0 %v144_v20  ;;  %236 = vmatpush.msra.mxu1 %v225_v21  ;;  %v136_v43 = vld [vmem:[%s1221_s3 + $0x10] sm:$0xff]  ;;  %v135_v45 = vld [vmem:[%s1221_s3 + $0x8] sm:$0xff]  ;;  %v134_v47 = vld [vmem:[%s1221_s3] sm:$0xff] }
  0x10   :  { %766 = vmatpush.msra.mxu2 %v145_v17  ;;  %782 = vmatpush.msra.mxu3 %v226_v18  ;;  %v217_v44 = vld [vmem:[%s1222_s4 + $0x10] sm:$0xff]  ;;  %v216_v46 = vld [vmem:[%s1222_s4 + $0x8] sm:$0xff]  ;;  %v215_v48 = vld [vmem:[%s1222_s4] sm:$0xff] }
  0x11   :  { %156 = vmatpush.msra.mxu0 %v143_v22  ;;  %237 = vmatpush.msra.mxu1 %v224_v23  ;;  %v685_v4 = vld [vmem:[%s1223_s1] sm:$0xff]  }
  0x12   :  { %72 = vperm.xlu1 %797, %v31_v15   ;;  %48 = vperm.xlu0 %796, %v23_v16   ;;  %v717_v5 = vld [vmem:[%s1224_s2] sm:$0xff]   ;;  %v686_v6 = vunpack.c.l.bf16 %v685_v4  ;;  %v687_v18 = vunpack.c.h.bf16 %v685_v4 }
  0x13   :  { %767 = vmatpush.msra.mxu2 %v144_v20  ;;  %783 = vmatpush.msra.mxu3 %v225_v21  ;;  %v718_v7 = vunpack.c.l.bf16 %v717_v5  ;;  %v751_v12 = vld [vmem:[%s1223_s1 + $0x20] sm:$0xff]  }
  0x14   :  { %51 = vperm.xlu2 %798, %v24_v19   ;;  %157 = vmatpush.msra.mxu0 %v142_v31  ;;  %v758_v13 = vld [vmem:[%s1224_s2 + $0x20] sm:$0xff]   ;;  %v702_v14 = vunpack.c.l.bf16 %v751_v12  ;;  %v719_v19 = vunpack.c.h.bf16 %v717_v5 }
  0x15   :  { %768 = vmatpush.msra.mxu2 %v143_v22  ;;  %784 = vmatpush.msra.mxu3 %v224_v23  ;;  %v999_v8 = vsub.f32 %v686_v6, %v718_v7  ;;  %v734_v15 = vunpack.c.l.bf16 %v758_v13  ;;  %v703_v22 = vunpack.c.h.bf16 %v751_v12  ;;  %v735_v23 = vunpack.c.h.bf16 %v758_v13 }
  0x16   :  { %238 = vmatpush.msra.mxu1 %v223_v32  ;;  %158 = vmatpush.msra.mxu0 %v141_v33 }
  0x17   :  { %769 = vmatpush.msra.mxu2 %v142_v31  ;;  %785 = vmatpush.msra.mxu3 %v223_v32  ;;  %v1014_v17 = vsub.f32 %v702_v14, %v734_v15  ;;  %v759_v31 = vld [vmem:[%s1224_s2 + $0x28] sm:$0xff]   ;;  %v753_v15 = vld [vmem:[%s1223_s1 + $0x30] sm:$0xff]  }
  0x18   :  { %239 = vmatpush.msra.mxu1 %v222_v34  ;;  %159 = vmatpush.msra.mxu0 %v140_v35  ;;  %v739_v5 = vunpack.c.h.bf16 %v759_v31 }
  0x19   :  { %770 = vmatpush.msra.mxu2 %v141_v33  ;;  %786 = vmatpush.msra.mxu3 %v222_v34 }
  0x1a   :  { %54 = vperm.xlu1 %797, %v25_v24   ;;  %75 = vperm.xlu0 %796, %v32_v25   ;;  %v1022_v25 = vsub.f32 %v687_v18, %v719_v19  ;;  %v760_v18 = vld [vmem:[%s1224_s2 + $0x30] sm:$0xff]  }
  0x1b   :  { %240 = vmatpush.msra.mxu1 %v221_v36  ;;  %771 = vmatpush.msra.mxu2 %v140_v35 }
  0x1c   :  { %78 = vperm.xlu2 %798, %v33_v26   ;;  %787 = vmatpush.msra.mxu3 %v221_v36 }
  0x1d   :  { %160 = vmatpush.msra.mxu0 %v139_v37  ;;  %241 = vmatpush.msra.mxu1 %v220_v38 }
  0x1e   :  { %772 = vmatpush.msra.mxu2 %v139_v37  ;;  %788 = vmatpush.msra.mxu3 %v220_v38 }
  0x1f   :  { %161 = vmatpush.msra.mxu0 %v138_v39  ;;  %242 = vmatpush.msra.mxu1 %v219_v40 }
  0x20   :  { %773 = vmatpush.msra.mxu2 %v138_v39  ;;  %789 = vmatpush.msra.mxu3 %v219_v40  ;;  %v738_v40 = vunpack.c.l.bf16 %v759_v31 }
  0x21   :  { %162 = vmatpush.msra.mxu0 %v137_v41  ;;  %243 = vmatpush.msra.mxu1 %v218_v42 }
  0x22   :  { %81 = vperm.xlu1 %797, %v34_v27   ;;  %57 = vperm.xlu0 %796, %v26_v28   ;;  %v748_v27 = vld [vmem:[%s1223_s1 + $0x8] sm:$0xff]  }
  0x23   :  { %774 = vmatpush.msra.mxu2 %v137_v41  ;;  %790 = vmatpush.msra.mxu3 %v218_v42  ;;  %v755_v28 = vld [vmem:[%s1224_s2 + $0x8] sm:$0xff]   ;;  %v690_v33 = vunpack.c.l.bf16 %v748_v27  ;;  %v691_v36 = vunpack.c.h.bf16 %v748_v27 }
  0x24   :  { %60 = vperm.xlu2 %798, %v27_v29   ;;  %163 = vmatpush.msra.mxu0 %v136_v43  ;;  %v1031_v29 = vsub.f32 %v703_v22, %v735_v23  ;;  %v722_v34 = vunpack.c.l.bf16 %v755_v28  ;;  %v723_v37 = vunpack.c.h.bf16 %v755_v28  ;;  %v710_v23 = vunpack.c.l.bf16 %v753_v15 }
  0x25   :  { %244 = vmatpush.msra.mxu1 %v217_v44  ;;  %775 = vmatpush.msra.mxu2 %v136_v43 }
  0x26   :  { %791 = vmatpush.msra.mxu3 %v217_v44  ;;  %164 = vmatpush.msra.mxu0 %v135_v45  ;;  %v1047_v42 = vsub.f32 %v690_v33, %v722_v34 }
  0x27   :  { %245 = vmatpush.msra.mxu1 %v216_v46  ;;  %776 = vmatpush.msra.mxu2 %v135_v45  ;;  %v749_v45 = vld [vmem:[%s1223_s1 + $0x10] sm:$0xff]  }
  0x28   :  { %792 = vmatpush.msra.mxu3 %v216_v46  ;;  %165 = vmatpush.msra.mxu0 %v134_v47  ;;  %v756_v46 = vld [vmem:[%s1224_s2 + $0x10] sm:$0xff]   ;;  %v694_v49 = vunpack.c.l.bf16 %v749_v45 }
  0x29   :  { %246 = vmatpush.msra.mxu1 %v215_v48  ;;  %777 = vmatpush.msra.mxu2 %v134_v47  ;;  %v1057_v47 = vsub.f32 %v691_v36, %v723_v37  ;;  %v754_v36 = vld [vmem:[%s1223_s1 + $0x38] sm:$0xff]  }
  0x2a   :  { %84 = vperm.xlu0 %796, %v35_v30   ;;  %793 = vmatpush.msra.mxu3 %v215_v48  ;;  %v752_v30 = vld [vmem:[%s1223_s1 + $0x28] sm:$0xff]   ;;  %v761_v37 = vld [vmem:[%s1224_s2 + $0x38] sm:$0xff]  }
  0x2b   :  { %v706_v39 = vunpack.c.l.bf16 %v752_v30  ;;  %v707_v4 = vunpack.c.h.bf16 %v752_v30 }
  0x2d   :  { %v1059_v48 = vsub.f32 %v706_v39, %v738_v40  ;;  %v1093_v13 = vsub.f32 %v707_v4, %v739_v5  ;;  %v711_v39 = vunpack.c.h.bf16 %v753_v15 }
  0x5e   :  { %v46_v55 = vpop.permute.xlu2 %45 }
  0x5f   :  { %vm88_vm3 = vcmp.eq.s32.totalorder %v975_v50, %v46_v55 }
  0x66   :  { %v70_v57 = vpop.permute.xlu2 %69 }
  0x67   :  { %vm96_vm5 = vcmp.eq.s32.totalorder %v975_v50, %v70_v57 }
  0x6e   :  { %v52_v60 = vpop.permute.xlu2 %51 }
  0x6f   :  { %vm90_vm7 = vcmp.eq.s32.totalorder %v975_v50, %v52_v60  ;;  %v695_v60 = vunpack.c.h.bf16 %v749_v45  ;;  %v714_v45 = vunpack.c.l.bf16 %v754_v36 }
  0x74   :  { %v40_v51 = vpop.permute.xlu0 %39  ;;  %v43_v53 = vpop.permute.xlu1 %42 }
  0x75   :  { %vm86_vm0 = vcmp.eq.s32.totalorder %v975_v50, %v40_v51  ;;  %vm87_vm1 = vcmp.eq.s32.totalorder %v975_v50, %v43_v53  ;;  %v726_v51 = vunpack.c.l.bf16 %v756_v46 }
  0x76   :  { %652 = vmatmul.msk.f32.vlgmr.msra.gmra.mxu0 %vm86_vm0, %v800_v52  ;;  %668 = vmatmul.msk.f32.vlgmr.msra.gmra.mxu1 %vm86_vm0, %v800_v52  ;;  %v79_v63 = vpop.permute.xlu2 %78  ;;  %vm392_vm0 = vcmask 261120  }
  0x77   :  { %vm99_vm11 = vcmp.eq.s32.totalorder %v975_v50, %v79_v63 }
  0x7c   :  { %v64_v54 = vpop.permute.xlu0 %63  ;;  %v67_v56 = vpop.permute.xlu1 %66 }
  0x7d   :  { %vm94_vm2 = vcmp.eq.s32.totalorder %v975_v50, %v64_v54  ;;  %vm95_vm4 = vcmp.eq.s32.totalorder %v975_v50, %v67_v56  ;;  %v1069_v56 = vsub.f32 %v694_v49, %v726_v51 }
  0x7e   :  { %653 = vmatmul.msk.f32.gmra.mxu0 %vm87_vm1, %v800_v52  ;;  %660 = vmatmul.msk.f32.vlgmr.msra.gmra.mxu2 %vm94_vm2, %v800_v52  ;;  %v61_v1 = vpop.permute.xlu2 %60 }
  0x7f   :  { %669 = vmatmul.msk.f32.gmra.mxu1 %vm87_vm1, %v800_v52  ;;  %676 = vmatmul.msk.f32.vlgmr.msra.gmra.mxu3 %vm94_vm2, %v800_v52  ;;  %vm93_vm13 = vcmp.eq.s32.totalorder %v975_v50, %v61_v1  ;;  %vm572_vm1 = vcmask 130112   ;;  %vm576_vm2 = vcmask 195712  }
  0x84   :  { %v49_v58 = vpop.permute.xlu0 %48  ;;  %v73_v59 = vpop.permute.xlu1 %72 }
  0x85   :  { %vm89_vm6 = vcmp.eq.s32.totalorder %v975_v50, %v49_v58  ;;  %vm97_vm8 = vcmp.eq.s32.totalorder %v975_v50, %v73_v59 }
  0x86   :  { %654 = vmatmul.msk.f32.gmra.mxu0 %vm88_vm3, %v800_v52  ;;  %661 = vmatmul.msk.f32.gmra.mxu2 %vm95_vm4, %v800_v52 }
  0x87   :  { %670 = vmatmul.msk.f32.gmra.mxu1 %vm88_vm3, %v800_v52  ;;  %677 = vmatmul.msk.f32.gmra.mxu3 %vm95_vm4, %v800_v52  ;;  %vm580_vm3 = vcmask 261312   ;;  %vm584_vm4 = vcmask 326912  }
  0x8c   :  { %v76_v61 = vpop.permute.xlu0 %75  ;;  %v55_v62 = vpop.permute.xlu1 %54 }
  0x8d   :  { %vm91_vm9 = vcmp.eq.s32.totalorder %v975_v50, %v55_v62  ;;  %vm98_vm10 = vcmp.eq.s32.totalorder %v975_v50, %v76_v61  ;;  %v727_v61 = vunpack.c.h.bf16 %v756_v46  ;;  %v746_v46 = vunpack.c.l.bf16 %v761_v37 }
  0x8e   :  { %655 = vmatmul.msk.f32.gmra.mxu0 %vm89_vm6, %v800_v52  ;;  %662 = vmatmul.msk.f32.gmra.mxu2 %vm96_vm5, %v800_v52 }
  0x8f   :  { %671 = vmatmul.msk.f32.gmra.mxu1 %vm89_vm6, %v800_v52  ;;  %678 = vmatmul.msk.f32.gmra.mxu3 %vm96_vm5, %v800_v52  ;;  %vm588_vm5 = vcmask 392512   ;;  %vm592_vm6 = vcmask 458112  }
  0x94   :  { %v58_v0 = vpop.permute.xlu0 %57  ;;  %v82_v2 = vpop.permute.xlu1 %81 }
  0x95   :  { %vm92_vm12 = vcmp.eq.s32.totalorder %v975_v50, %v58_v0  ;;  %vm100_vm14 = vcmp.eq.s32.totalorder %v975_v50, %v82_v2  ;;  %v1078_v0 = vsub.f32 %v695_v60, %v727_v61  ;;  %v750_v2 = vld [vmem:[%s1223_s1 + $0x18] sm:$0xff]  }
  0x96   :  { %656 = vmatmul.msk.f32.gmra.mxu0 %vm90_vm7, %v800_v52  ;;  %663 = vmatmul.msk.f32.gmra.mxu2 %vm97_vm8, %v800_v52  ;;  %v699_v30 = vunpack.c.h.bf16 %v750_v2 }
  0x97   :  { %672 = vmatmul.msk.f32.gmra.mxu1 %vm90_vm7, %v800_v52  ;;  %679 = vmatmul.msk.f32.gmra.mxu3 %vm97_vm8, %v800_v52  ;;  %vm596_vm7 = vcmask 523712   ;;  %vm600_vm8 = vcmask 589312  }
  0x9c   :  { %v85_v3 = vpop.permute.xlu0 %84 }
  0x9d   :  { %vm101_vm15 = vcmp.eq.s32.totalorder %v975_v50, %v85_v3  ;;  %v757_v3 = vld [vmem:[%s1224_s2 + $0x18] sm:$0xff]  }
  0x9e   :  { %657 = vmatmul.msk.f32.gmra.mxu0 %vm91_vm9, %v800_v52  ;;  %664 = vmatmul.msk.f32.gmra.mxu2 %vm98_vm10, %v800_v52  ;;  %v730_v12 = vunpack.c.l.bf16 %v757_v3  ;;  %v731_v31 = vunpack.c.h.bf16 %v757_v3 }
  0x9f   :  { %673 = vmatmul.msk.f32.gmra.mxu1 %vm91_vm9, %v800_v52  ;;  %680 = vmatmul.msk.f32.gmra.mxu3 %vm98_vm10, %v800_v52  ;;  %vm604_vm9 = vcmask 654912   ;;  %vm608_vm10 = vcmask 720512  }
  0xa6   :  { %658 = vmatmul.msk.f32.gmra.mxu0 %vm92_vm12, %v800_v52  ;;  %665 = vmatmul.msk.f32.gmra.mxu2 %vm99_vm11, %v800_v52 }
  0xa7   :  { %674 = vmatmul.msk.f32.gmra.mxu1 %vm92_vm12, %v800_v52  ;;  %681 = vmatmul.msk.f32.gmra.mxu3 %vm99_vm11, %v800_v52  ;;  %vm612_vm11 = vcmask 786112   ;;  %vm616_vm12 = vcmask 851712  }
  0xae   :  { %659 = vmatmul.msk.f32.gmra.mxu0 %vm93_vm13, %v800_v52  ;;  %666 = vmatmul.msk.f32.gmra.mxu2 %vm100_vm14, %v800_v52 }
  0xaf   :  { %675 = vmatmul.msk.f32.gmra.mxu1 %vm93_vm13, %v800_v52  ;;  %682 = vmatmul.msk.f32.gmra.mxu3 %vm100_vm14, %v800_v52  ;;  %vm620_vm13 = vcmask 917312   ;;  %vm624_vm14 = vcmask 982912  }
  0xb6   :  { %667 = vmatmul.msk.f32.gmra.mxu2 %vm101_vm15, %v800_v52 }
  0xb7   :  { %683 = vmatmul.msk.f32.gmra.mxu3 %vm101_vm15, %v800_v52  ;;  %vm628_vm15 = vcmask 1048512  }
  0xf3   :  { %v1001_v9 = vpop.f32.mrf.mxu1 }
  0xf4   :  { %v376_v10 = vmul.f32 %v999_v8, %v1001_v9 }
  0xf6   :  { %v393_v11 = vsel %vm392_vm0, %v376_v10, 0.0 }
  0xf7   :  { %394 = vadd.xlane.f32.xlu1 %v393_v11  ;;  %v698_v11 = vunpack.c.l.bf16 %v750_v2 }
  0xf9   :  { %v1102_v19 = vsub.f32 %v698_v11, %v730_v12  ;;  %v167_v11 = vpop.f32.mrf.mxu0 }
  0xfc   :  { %v1012_v16 = vpop.f32.mrf.mxu1 }
  0xfd   :  { %v377_v32 = vmul.f32 %v1022_v25, %v1012_v16 }
  0xff   :  { %v396_v43 = vsel %vm392_vm0, %v377_v32, 0.0 }
 0x101   :  { %v170_v12 = vpop.f32.mrf.mxu0 }
 0x102   :  { %v1016_v20 = vpop.f32.mrf.mxu3 }
 0x103   :  { %v384_v21 = vmul.f32 %v1014_v17, %v1016_v20 }
 0x104   :  { %v1020_v24 = vpop.f32.mrf.mxu1 }
 0x105   :  { %v417_v26 = vsel %vm392_vm0, %v384_v21, 0.0  ;;  %v378_v52 = vmul.f32 %v1047_v42, %v1020_v24 }
 0x106   :  { %418 = vadd.xlane.f32.xlu2 %v417_v26  ;;  %v742_v26 = vunpack.c.l.bf16 %v760_v18 }
 0x107   :  { %v399_v58 = vsel %vm392_vm0, %v378_v52, 0.0 }
 0x108   :  { %v1112_v32 = vsub.f32 %v710_v23, %v742_v26 }
 0x109   :  { %v173_v26 = vpop.f32.mrf.mxu0 }
 0x10a   :  { %v1041_v35 = vpop.f32.mrf.mxu3 }
 0x10b   :  { %v385_v38 = vmul.f32 %v1031_v29, %v1041_v35 }
 0x10c   :  { %v1045_v41 = vpop.f32.mrf.mxu1 }
 0x10d   :  { %v420_v44 = vsel %vm392_vm0, %v385_v38, 0.0  ;;  %v379_v53 = vmul.f32 %v1057_v47, %v1045_v41  ;;  %v1122_v38 = vsub.f32 %v699_v30, %v731_v31 }
 0x10e   :  { %397 = vadd.xlane.f32.xlu2 %v396_v43  ;;  %421 = vadd.xlane.f32.xlu0 %v420_v44  ;;  %v743_v44 = vunpack.c.h.bf16 %v760_v18  ;;  %v441_v18 = vadd.f32 %v999_v8, %v167_v11 }
 0x10f   :  { %v402_v62 = vsel %vm392_vm0, %v379_v53, 0.0 }
 0x110   :  { %v1132_v52 = vsub.f32 %v711_v39, %v743_v44 }
 0x112   :  { %v1065_v54 = vpop.f32.mrf.mxu3 }
 0x113   :  { %v386_v55 = vmul.f32 %v1059_v48, %v1065_v54 }
 0x114   :  { %v1071_v57 = vpop.f32.mrf.mxu1 }
 0x115   :  { %v423_v59 = vsel %vm392_vm0, %v386_v55, 0.0  ;;  %v380_v63 = vmul.f32 %v1069_v56, %v1071_v57 }
 0x116   :  { %400 = vadd.xlane.f32.xlu0 %v399_v58  ;;  %424 = vadd.xlane.f32.xlu1 %v423_v59  ;;  %v1136_v58 = vsub.f32 %v714_v45, %v746_v46  ;;  %v442_v46 = vadd.f32 %v1022_v25, %v170_v12 }
 0x117   :  { %403 = vadd.xlane.f32.xlu2 %v402_v62  ;;  %v405_v10 = vsel %vm392_vm0, %v380_v63, 0.0  ;;  %v715_v62 = vunpack.c.h.bf16 %v754_v36  ;;  %v747_v63 = vunpack.c.h.bf16 %v761_v37 }
 0x119   :  { %v1146_v4 = vsub.f32 %v715_v62, %v747_v63 }
 0x11a   :  { %v1080_v1 = vpop.f32.mrf.mxu3 }
 0x11b   :  { %v387_v22 = vmul.f32 %v1093_v13, %v1080_v1 }
 0x11c   :  { %v1088_v6 = vpop.f32.mrf.mxu1 }
 0x11d   :  { %v381_v7 = vmul.f32 %v1078_v0, %v1088_v6  ;;  %v426_v33 = vsel %vm392_vm0, %v387_v22, 0.0 }
 0x11e   :  { %406 = vadd.xlane.f32.xlu1 %v405_v10 }
 0x11f   :  { %v408_v14 = vsel %vm392_vm0, %v381_v7, 0.0 }
 0x120   :  { %409 = vadd.xlane.f32.xlu2 %v408_v14  ;;  %v191_v14 = vpop.f32.mrf.mxu2 }
 0x121   :  { %v449_v36 = vadd.f32 %v1014_v17, %v191_v14 }
 0x122   :  { %v1104_v21 = vpop.f32.mrf.mxu3 }
 0x123   :  { %v388_v43 = vmul.f32 %v1112_v32, %v1104_v21 }
 0x124   :  { %v1108_v27 = vpop.f32.mrf.mxu1 }
 0x125   :  { %v382_v28 = vmul.f32 %v1102_v19, %v1108_v27  ;;  %v429_v53 = vsel %vm392_vm0, %v388_v43, 0.0 }
 0x127   :  { %v411_v34 = vsel %vm392_vm0, %v382_v28, 0.0 }
 0x128   :  { %427 = vadd.xlane.f32.xlu2 %v426_v33  ;;  %412 = vadd.xlane.f32.xlu0 %v411_v34  ;;  %v194_v31 = vpop.f32.mrf.mxu2  ;;  %v176_v33 = vpop.f32.mrf.mxu0 }
 0x129   :  { %v444_v12 = vadd.f32 %v1057_v47, %v176_v33 }
 0x12a   :  { %v1124_v40 = vpop.f32.mrf.mxu3 }
 0x12b   :  { %v389_v60 = vmul.f32 %v1132_v52, %v1124_v40 }
 0x12c   :  { %v1128_v49 = vpop.f32.mrf.mxu1 }
 0x12d   :  { %v383_v51 = vmul.f32 %v1122_v38, %v1128_v49  ;;  %v432_v3 = vsel %vm392_vm0, %v389_v60, 0.0 }
 0x12f   :  { %v414_v55 = vsel %vm392_vm0, %v383_v51, 0.0  ;;  %v450_v51 = vadd.f32 %v1031_v29, %v194_v31  ;;  %v443_v29 = vadd.f32 %v1047_v42, %v173_v26 }
 0x130   :  { %430 = vadd.xlane.f32.xlu0 %v429_v53  ;;  %415 = vadd.xlane.f32.xlu1 %v414_v55  ;;  %v197_v39 = vpop.f32.mrf.mxu2  ;;  %v179_v60 = vpop.f32.mrf.mxu0 }
 0x131   :  { %v445_v47 = vadd.f32 %v1069_v56, %v179_v60 }
 0x132   :  { %v1138_v59 = vpop.f32.mrf.mxu3 }
 0x133   :  { %v390_v61 = vmul.f32 %v1136_v58, %v1138_v59 }
 0x135   :  { %v435_v2 = vsel %vm392_vm0, %v390_v61, 0.0 }
 0x136   :  { %436 = vadd.xlane.f32.xlu2 %v435_v2 }
 0x138   :  { %433 = vadd.xlane.f32.xlu1 %v432_v3 }
 0x13a   :  { %v1148_v5 = vpop.f32.mrf.mxu3 }
 0x13b   :  { %v391_v7 = vmul.f32 %v1146_v4, %v1148_v5 }
 0x13d   :  { %v438_v10 = vsel %vm392_vm0, %v391_v7, 0.0 }
 0x13e   :  { %439 = vadd.xlane.f32.xlu0 %v438_v10 }
 0x16a   :  { %v395_v15 = vpop.xlane.xlu1 %394 }
 0x16b   :  { %v457_v22 = vmul.f32 %v395_v15, %v1001_v9 }
 0x16d   :  { %v473_v23 = vsub.f32 %v441_v18, %v457_v22  ;;  %v182_v22 = vpop.f32.mrf.mxu0 }
 0x16e   :  { %v446_v33 = vadd.f32 %v1078_v0, %v182_v22 }
 0x16f   :  { %v489_v28 = vand.u32 2147483647, %v473_v23 }
 0x171   :  { %v505_v30 = vsel %vm392_vm0, %v489_v28, 0.0 }
 0x172   :  { %506 = vadd.xlane.f32.xlu1 %v505_v30 }
 0x179   :  { %v419_v34 = vpop.xlane.xlu2 %418 }
 0x17a   :  { %v465_v37 = vmul.f32 %v419_v34, %v1016_v20  ;;  %v200_v20 = vpop.f32.mrf.mxu2 }
 0x17c   :  { %v481_v43 = vsub.f32 %v449_v36, %v465_v37 }
 0x17e   :  { %v497_v44 = vand.u32 2147483647, %v481_v43 }
 0x180   :  { %v529_v8 = vsel %vm392_vm0, %v497_v44, 0.0  ;;  %v185_v44 = vpop.f32.mrf.mxu0 }
 0x181   :  { %v398_v45 = vpop.xlane.xlu2 %397  ;;  %530 = vadd.xlane.f32.xlu0 %v529_v8  ;;  %v422_v9 = vpop.xlane.xlu0 %421  ;;  %v447_v0 = vadd.f32 %v1102_v19, %v185_v44 }
 0x182   :  { %v458_v53 = vmul.f32 %v398_v45, %v1012_v16  ;;  %v466_v55 = vmul.f32 %v422_v9, %v1041_v35  ;;  %v451_v16 = vadd.f32 %v1059_v48, %v197_v39  ;;  %v203_v34 = vpop.f32.mrf.mxu2 }
 0x184   :  { %v474_v17 = vsub.f32 %v442_v46, %v458_v53  ;;  %v482_v61 = vsub.f32 %v450_v51, %v466_v55  ;;  %v452_v51 = vadd.f32 %v1093_v13, %v200_v20  ;;  %v453_v13 = vadd.f32 %v1112_v32, %v203_v34 }
 0x186   :  { %v490_v62 = vand.u32 2147483647, %v474_v17  ;;  %v498_v63 = vand.u32 2147483647, %v482_v61 }
 0x188   :  { %v508_v2 = vsel %vm392_vm0, %v490_v62, 0.0  ;;  %v532_v3 = vsel %vm392_vm0, %v498_v63, 0.0  ;;  %v188_v62 = vpop.f32.mrf.mxu0 }
 0x189   :  { %v425_v7 = vpop.xlane.xlu1 %424  ;;  %509 = vadd.xlane.f32.xlu2 %v508_v2  ;;  %533 = vadd.xlane.f32.xlu1 %v532_v3  ;;  %v401_v25 = vpop.xlane.xlu0 %400  ;;  %v448_v19 = vadd.f32 %v1122_v38, %v188_v62 }
 0x18a   :  { %v467_v35 = vmul.f32 %v425_v7, %v1065_v54  ;;  %v404_v10 = vpop.xlane.xlu2 %403  ;;  %v459_v11 = vmul.f32 %v401_v25, %v1020_v24  ;;  %v206_v9 = vpop.f32.mrf.mxu2 }
 0x18b   :  { %v460_v14 = vmul.f32 %v404_v10, %v1045_v41  ;;  %v454_v38 = vadd.f32 %v1132_v52, %v206_v9 }
 0x18c   :  { %v483_v15 = vsub.f32 %v451_v16, %v467_v35  ;;  %v475_v18 = vsub.f32 %v443_v29, %v459_v11 }
 0x18d   :  { %v476_v23 = vsub.f32 %v444_v12, %v460_v14 }
 0x18e   :  { %v499_v28 = vand.u32 2147483647, %v483_v15  ;;  %v491_v30 = vand.u32 2147483647, %v475_v18 }
 0x18f   :  { %v492_v31 = vand.u32 2147483647, %v476_v23 }
 0x190   :  { %v535_v42 = vsel %vm392_vm0, %v499_v28, 0.0  ;;  %v511_v48 = vsel %vm392_vm0, %v491_v30, 0.0 }
 0x191   :  { %v407_v54 = vpop.xlane.xlu1 %406  ;;  %536 = vadd.xlane.f32.xlu2 %v535_v42  ;;  %v514_v24 = vsel %vm392_vm0, %v492_v31, 0.0  ;;  %512 = vadd.xlane.f32.xlu0 %v511_v48 }
 0x192   :  { %v461_v41 = vmul.f32 %v407_v54, %v1071_v57  ;;  %515 = vadd.xlane.f32.xlu1 %v514_v24  ;;  %v209_v20 = vpop.f32.mrf.mxu2 }
 0x193   :  { %v410_v26 = vpop.xlane.xlu2 %409  ;;  %v455_v11 = vadd.f32 %v1136_v58, %v209_v20  ;;  %v610_v20 = vadd.s32 4294967208, %v975_v50 }
 0x194   :  { %v477_v36 = vsub.f32 %v445_v47, %v461_v41  ;;  %v462_v37 = vmul.f32 %v410_v26, %v1088_v6  ;;  %v570_v26 = vadd.s32 4294967288, %v975_v50 }
 0x196   :  { %v478_v39 = vsub.f32 %v446_v33, %v462_v37  ;;  %v493_v43 = vand.u32 2147483647, %v477_v36  ;;  %v578_v37 = vadd.s32 4294967272, %v975_v50 }
 0x198   :  { %v517_v8 = vsel %vm392_vm0, %v493_v43, 0.0  ;;  %v494_v45 = vand.u32 2147483647, %v478_v39  ;;  %v582_v43 = vadd.s32 4294967264, %v975_v50 }
 0x199   :  { %518 = vadd.xlane.f32.xlu2 %v517_v8 }
 0x19a   :  { %v520_v46 = vsel %vm392_vm0, %v494_v45, 0.0  ;;  %v212_v23 = vpop.f32.mrf.mxu2 }
 0x19b   :  { %v428_v56 = vpop.xlane.xlu2 %427  ;;  %521 = vadd.xlane.f32.xlu0 %v520_v46  ;;  %v413_v57 = vpop.xlane.xlu0 %412  ;;  %v456_v30 = vadd.f32 %v1146_v4, %v212_v23  ;;  %v574_v4 = vadd.s32 4294967280, %v975_v50  ;;  %v586_v46 = vadd.s32 4294967256, %v975_v50 }
 0x19c   :  { %v468_v53 = vmul.f32 %v428_v56, %v1080_v1  ;;  %v463_v6 = vmul.f32 %v413_v57, %v1108_v27 }
 0x19e   :  { %v484_v55 = vsub.f32 %v452_v51, %v468_v53  ;;  %v479_v60 = vsub.f32 %v447_v0, %v463_v6  ;;  %v590_v0 = vadd.s32 4294967248, %v975_v50 }
 0x1a0   :  { %v500_v17 = vand.u32 2147483647, %v484_v55  ;;  %v495_v61 = vand.u32 2147483647, %v479_v60  ;;  %v594_v60 = vadd.s32 4294967240, %v975_v50 }
 0x1a2   :  { %v538_v63 = vsel %vm392_vm0, %v500_v17, 0.0  ;;  %v523_v2 = vsel %vm392_vm0, %v495_v61, 0.0  ;;  %v598_v17 = vadd.s32 4294967232, %v975_v50 }
 0x1a3   :  { %v416_v3 = vpop.xlane.xlu1 %415  ;;  %539 = vadd.xlane.f32.xlu0 %v538_v63  ;;  %524 = vadd.xlane.f32.xlu1 %v523_v2  ;;  %v431_v7 = vpop.xlane.xlu0 %430  ;;  %v602_v63 = vadd.s32 4294967224, %v975_v50  ;;  %v606_v2 = vadd.s32 4294967216, %v975_v50 }
 0x1a4   :  { %v464_v1 = vmul.f32 %v416_v3, %v1128_v49  ;;  %v469_v27 = vmul.f32 %v431_v7, %v1104_v21 }
 0x1a6   :  { %v480_v25 = vsub.f32 %v448_v19, %v464_v1  ;;  %v485_v29 = vsub.f32 %v453_v13, %v469_v27 }
 0x1a8   :  { %v496_v16 = vand.u32 2147483647, %v480_v25  ;;  %v501_v35 = vand.u32 2147483647, %v485_v29 }
 0x1a9   :  { %v437_v10 = vpop.xlane.xlu2 %436 }
 0x1aa   :  { %v471_v12 = vmul.f32 %v437_v10, %v1138_v59  ;;  %v526_v14 = vsel %vm392_vm0, %v496_v16, 0.0  ;;  %v541_v32 = vsel %vm392_vm0, %v501_v35, 0.0 }
 0x1ab   :  { %v434_v15 = vpop.xlane.xlu1 %433  ;;  %527 = vadd.xlane.f32.xlu2 %v526_v14  ;;  %542 = vadd.xlane.f32.xlu1 %v541_v32 }
 0x1ac   :  { %v487_v21 = vsub.f32 %v455_v11, %v471_v12  ;;  %v470_v49 = vmul.f32 %v434_v15, %v1124_v40  ;;  %v618_v11 = vadd.s32 4294967192, %v975_v50  ;;  %v614_v12 = vadd.s32 4294967200, %v975_v50 }
 0x1ae   :  { %v486_v18 = vsub.f32 %v454_v38, %v470_v49  ;;  %v503_v22 = vand.u32 2147483647, %v487_v21 }
 0x1b0   :  { %v547_v28 = vsel %vm392_vm0, %v503_v22, 0.0  ;;  %v502_v58 = vand.u32 2147483647, %v486_v18  ;;  %v622_v22 = vadd.s32 4294967184, %v975_v50 }
 0x1b1   :  { %548 = vadd.xlane.f32.xlu0 %v547_v28  ;;  %v440_v59 = vpop.xlane.xlu0 %439  ;;  %v626_v28 = vadd.s32 4294967176, %v975_v50 }
 0x1b2   :  { %v472_v31 = vmul.f32 %v440_v59, %v1148_v5  ;;  %v544_v34 = vsel %vm392_vm0, %v502_v58, 0.0 }
 0x1b3   :  { %545 = vadd.xlane.f32.xlu2 %v544_v34 }
 0x1b4   :  { %v488_v42 = vsub.f32 %v456_v30, %v472_v31 }
 0x1b6   :  { %v504_v52 = vand.u32 2147483647, %v488_v42 }
 0x1b8   :  { %v550_v48 = vsel %vm392_vm0, %v504_v52, 0.0 }
 0x1b9   :  { %551 = vadd.xlane.f32.xlu1 %v550_v48 }
 0x1e5   :  { %v507_v40 = vpop.xlane.xlu1 %506 }
 0x1e6   :  { %v569_v44 = vperm.slane %v507_v40, %v975_v50 }
 0x1f4   :  { %v531_v24 = vpop.xlane.xlu0 %530 }
 0x1f5   :  { %v599_v19 = vperm.slane %v531_v24, %v598_v17 }
 0x1fc   :  { %v510_v54 = vpop.xlane.xlu2 %509  ;;  %v534_v47 = vpop.xlane.xlu1 %533 }
 0x1fd   :  { %v571_v5 = vperm.slane %v510_v54, %v570_v26  ;;  %v603_v27 = vperm.slane %v534_v47, %v602_v63 }
 0x1ff   :  { %v573_v45 = vsel %vm572_vm1, %v571_v5, %v569_v44 }
 0x204   :  { %v537_v41 = vpop.xlane.xlu2 %536  ;;  %v513_v33 = vpop.xlane.xlu0 %512 }
 0x205   :  { %v516_v36 = vpop.xlane.xlu1 %515  ;;  %v575_v39 = vperm.slane %v513_v33, %v574_v4  ;;  %v607_v16 = vperm.slane %v537_v41, %v606_v2 }
 0x206   :  { %v579_v9 = vperm.slane %v516_v36, %v578_v37 }
 0x207   :  { %v577_v57 = vsel %vm576_vm2, %v575_v39, %v573_v45 }
 0x208   :  { %v581_v6 = vsel %vm580_vm3, %v579_v9, %v577_v57 }
 0x20c   :  { %v519_v8 = vpop.xlane.xlu2 %518 }
 0x20d   :  { %v583_v51 = vperm.slane %v519_v8, %v582_v43 }
 0x20e   :  { %v522_v56 = vpop.xlane.xlu0 %521 }
 0x20f   :  { %v587_v55 = vperm.slane %v522_v56, %v586_v46  ;;  %v585_v61 = vsel %vm584_vm4, %v583_v51, %v581_v6 }
 0x211   :  { %v589_v7 = vsel %vm588_vm5, %v587_v55, %v585_v61 }
 0x216   :  { %v525_v53 = vpop.xlane.xlu1 %524  ;;  %v540_v25 = vpop.xlane.xlu0 %539 }
 0x217   :  { %v591_v62 = vperm.slane %v525_v53, %v590_v0  ;;  %v611_v15 = vperm.slane %v540_v25, %v610_v20 }
 0x219   :  { %v593_v1 = vsel %vm592_vm6, %v591_v62, %v589_v7 }
 0x21e   :  { %v528_v3 = vpop.xlane.xlu2 %527  ;;  %v543_v14 = vpop.xlane.xlu1 %542 }
 0x21f   :  { %v595_v13 = vperm.slane %v528_v3, %v594_v60  ;;  %v615_v18 = vperm.slane %v543_v14, %v614_v12 }
 0x221   :  { %v597_v29 = vsel %vm596_vm7, %v595_v13, %v593_v1 }
 0x222   :  { %v601_v35 = vsel %vm600_vm8, %v599_v19, %v597_v29 }
 0x223   :  { %v605_v10 = vsel %vm604_vm9, %v603_v27, %v601_v35 }
 0x224   :  { %v609_v32 = vsel %vm608_vm10, %v607_v16, %v605_v10  ;;  %v549_v23 = vpop.xlane.xlu0 %548 }
 0x225   :  { %v613_v21 = vsel %vm612_vm11, %v611_v15, %v609_v32  ;;  %v623_v30 = vperm.slane %v549_v23, %v622_v22 }
 0x226   :  { %v546_v38 = vpop.xlane.xlu2 %545  ;;  %v617_v58 = vsel %vm616_vm12, %v615_v18, %v613_v21 }
 0x227   :  { %v619_v49 = vperm.slane %v546_v38, %v618_v11 }
 0x229   :  { %v621_v59 = vsel %vm620_vm13, %v619_v49, %v617_v58 }
 0x22a   :  { %v625_v42 = vsel %vm624_vm14, %v623_v30, %v621_v59 }
 0x22c   :  { %v552_v31 = vpop.xlane.xlu1 %551 }
 0x22d   :  { %v627_v34 = vperm.slane %v552_v31, %v626_v28 }
 0x22f   :  { %v629_v52 = vsel %vm628_vm15, %v627_v34, %v625_v42 }
 0x230   :  { %631 = vst [vmem:[%s1225_s5] sm:$0x1] %v629_v52 }

</bundles_post_ra>
